<compile_context>
chip_gen: v7x
topology: tpu7x:2x2x1
jax: 0.10.0
libtpu: 0.0.40
codegen_flags: <defaults>
</compile_context>

<pallas_src>
import functools

import jax
import jax.numpy as jnp
from jax.experimental import pallas as pl
from jax.experimental.pallas import tpu as pltpu


def lstm_fc_kernel(x_ref, w_ih_ref, w_hh_ref, b_ref, fc_w_ref, fc_b_ref,
                   out_ref, xp_ref, *, seq_len, batch, hidden_size):
    """Whole LSTM + fc in one kernel invocation. Everything fits in VMEM (~20 KB)."""
    H = hidden_size
    B = batch

    # --- Off the serial path: all S input projections in one parallel matmul, bias added once.
    # x_ref is (S*B, F), rows ordered (t, b).
    xp_ref[...] = (jnp.dot(x_ref[...], w_ih_ref[...],
                           preferred_element_type=jnp.float32)
                   + b_ref[...])                                   # (S*B, 4H)

    w_hh = w_hh_ref[...]                                           # resident, read once

    def step(t, carry):
        h, c = carry
        # Only the hidden-state matmul is on the step-to-step critical path.
        gates = xp_ref[pl.ds(t * B, B), :] + jnp.dot(
            h, w_hh, preferred_element_type=jnp.float32)           # (B, 4H)

        # Two full-width EUP pushes per step (instead of four narrow ones), then
        # static lane slices for the (i, f, g, o) chunks (PyTorch gate order).
        s = jax.nn.sigmoid(gates)
        tg = jnp.tanh(gates)
        i = s[:, 0 * H:1 * H]
        f = s[:, 1 * H:2 * H]
        g = tg[:, 2 * H:3 * H]
        o = s[:, 3 * H:4 * H]

        c_new = f * c + i * g
        h_new = o * jnp.tanh(c_new)
        return h_new, c_new

    h0 = jnp.zeros((B, H), jnp.float32)
    c0 = jnp.zeros((B, H), jnp.float32)
    h, _ = jax.lax.fori_loop(0, seq_len, step, (h0, c0), unroll=True)

    # out = fc(encoder_output[-1, 0, :]) : VPU multiply + lane reduction, one tiny store.
    prod = h[0:1, :] * fc_w_ref[...]                               # (1, H)
    out_ref[...] = jnp.sum(prod, axis=-1, keepdims=True) + fc_b_ref[...]


def lstm_module_forward(X, params):
    """Pallas implementation of LstmModule.forward. Returns a scalar (out.squeeze())."""
    if X.ndim == 2:
        X = X[:, None, :]          # unsqueeze(1): (seq, 1, features)
    X = X.astype(jnp.float32)
    S, B, F = X.shape
    H = params["w_hh"].shape[0]

    # Layout plumbing only (no compute hoisted out of the kernel): flatten (t, b) rows.
    X2 = X.reshape(S * B, F)

    kernel = functools.partial(lstm_fc_kernel, seq_len=S, batch=B, hidden_size=H)
    out = pl.pallas_call(
        kernel,
        out_shape=jax.ShapeDtypeStruct((1, 1), jnp.float32),
        # No grid: single invocation; all operands live as full blocks in VMEM
        # (no double-buffering, no redundant per-step DMA descriptors).
        in_specs=[pl.BlockSpec(memory_space=pltpu.MemorySpace.VMEM)] * 6,
        out_specs=pl.BlockSpec(memory_space=pltpu.MemorySpace.VMEM),
        scratch_shapes=[
            pltpu.VMEM((S * B, 4 * H), jnp.float32),   # precomputed x-projections
        ],
    )(X2, params["w_ih"], params["w_hh"], params["b"], params["fc_w"], params["fc_b"])
    return out[0, 0]


def reference_forward(X, params):
    """Pure-JAX reference mirroring LstmModule.forward semantics."""
    if X.ndim == 2:
        X = X[:, None, :]
    X = X.astype(jnp.float32)
    S, B, _ = X.shape
    H = params["w_hh"].shape[0]
    h = jnp.zeros((B, H), jnp.float32)
    c = jnp.zeros((B, H), jnp.float32)
    for t in range(S):
        gates = X[t] @ params["w_ih"] + h @ params["w_hh"] + params["b"]
        i = jax.nn.sigmoid(gates[:, 0 * H:1 * H])
        f = jax.nn.sigmoid(gates[:, 1 * H:2 * H])
        g = jnp.tanh(gates[:, 2 * H:3 * H])
        o = jax.nn.sigmoid(gates[:, 3 * H:4 * H])
        c = f * c + i * g
        h = o * jnp.tanh(c)
    out = h[0:1] @ params["fc_w"].T + params["fc_b"]
    return out[0, 0]


def init_params(key, n_features, hidden_size):
    """Deterministic init matching PyTorch LSTM/Linear parameter shapes.

    LSTM weights are stored transposed (input-major) so the kernel does x @ W with no
    in-kernel transposes; fc weight is kept as a (1, hidden) row vector (PyTorch layout).
    """
    k = 1.0 / jnp.sqrt(hidden_size)
    ks = jax.random.split(key, 6)
    w_ih = jax.random.uniform(ks[0], (n_features, 4 * hidden_size), jnp.float32, -k, k)
    w_hh = jax.random.uniform(ks[1], (hidden_size, 4 * hidden_size), jnp.float32, -k, k)
    b_ih = jax.random.uniform(ks[2], (1, 4 * hidden_size), jnp.float32, -k, k)
    b_hh = jax.random.uniform(ks[3], (1, 4 * hidden_size), jnp.float32, -k, k)
    fc_w = jax.random.uniform(ks[4], (1, hidden_size), jnp.float32, -k, k)
    fc_b = jax.random.uniform(ks[5], (1, 1), jnp.float32, -k, k)
    return {
        "w_ih": w_ih,
        "w_hh": w_hh,
        "b": b_ih + b_hh,   # PyTorch applies b_ih + b_hh; fold them once at init
        "fc_w": fc_w,
        "fc_b": fc_b,
    }


if __name__ == "__main__":
    n_features = 4
    hidden_size = 32
    seq_len = 8

    key = jax.random.PRNGKey(0)
    k_x, k_p = jax.random.split(key)
    # 2-D input (seq, n_features), as accepted by LstmModule.forward (gets unsqueezed).
    X = jax.random.normal(k_x, (seq_len, n_features), jnp.float32)
    params = init_params(k_p, n_features, hidden_size)

    out = lstm_module_forward(X, params)
    out = jax.block_until_ready(out)

    ref = reference_forward(X, params)
    assert out.shape == ()  # out.squeeze() of a Linear(hidden, 1) output
    assert jnp.allclose(out, ref, rtol=1e-4, atol=1e-5), (out, ref)

    print("KERNEL_OK")
</pallas_src>

<mosaic_0001>
module attributes {stable_mosaic.version = 11 : i64} {
  func.func @lstm_fc_kernel(%arg0: memref<8x4xf32, #tpu.memory_space<vmem>>, %arg1: memref<4x128xf32, #tpu.memory_space<vmem>>, %arg2: memref<32x128xf32, #tpu.memory_space<vmem>>, %arg3: memref<1x128xf32, #tpu.memory_space<vmem>>, %arg4: memref<1x32xf32, #tpu.memory_space<vmem>>, %arg5: memref<1x1xf32, #tpu.memory_space<vmem>>, %arg6: memref<1x1xf32, #tpu.memory_space<vmem>>, %arg7: memref<8x128xf32, #tpu.memory_space<vmem>>) attributes {dimension_semantics = [], scalar_prefetch = 0 : i64, scratch_operands = 1 : i64, tpu.core_type = #tpu.core_type<tc>} {
    %c0 = arith.constant 0 : index
    %c0_0 = arith.constant 0 : index
    %0 = vector.load %arg0[%c0, %c0_0] : memref<8x4xf32, #tpu.memory_space<vmem>>, vector<8x4xf32>
    %c0_1 = arith.constant 0 : index
    %c0_2 = arith.constant 0 : index
    %1 = vector.load %arg1[%c0_1, %c0_2] : memref<4x128xf32, #tpu.memory_space<vmem>>, vector<4x128xf32>
    %cst = arith.constant dense<0.000000e+00> : vector<8x128xf32>
    %2 = tpu.matmul %0, %1, %cst {dimension_numbers = #tpu.dot_dimension_numbers<[1], [0], [0], [1], [0, 0, 1, 1], [], []>} : vector<8x4xf32>, vector<4x128xf32>, vector<8x128xf32> -> vector<8x128xf32>
    %c0_3 = arith.constant 0 : index
    %c0_4 = arith.constant 0 : index
    %3 = vector.load %arg3[%c0_3, %c0_4] : memref<1x128xf32, #tpu.memory_space<vmem>>, vector<1x128xf32>
    %4 = vector.broadcast %3 : vector<1x128xf32> to vector<8x128xf32>
    %5 = arith.addf %2, %4 : vector<8x128xf32>
    %c0_5 = arith.constant 0 : index
    %c0_6 = arith.constant 0 : index
    %6 = vector.load %arg7[%c0_5, %c0_6] : memref<8x128xf32, #tpu.memory_space<vmem>>, vector<8x128xf32>
    tpu.vector_store %arg7[%c0_5, %c0_6], %5 {strides = array<i32>} : memref<8x128xf32, #tpu.memory_space<vmem>>, vector<8x128xf32>,
    %c0_7 = arith.constant 0 : index
    %c0_8 = arith.constant 0 : index
    %7 = vector.load %arg2[%c0_7, %c0_8] : memref<32x128xf32, #tpu.memory_space<vmem>>, vector<32x128xf32>
    %cst_9 = arith.constant 0.000000e+00 : f32
    %8 = vector.broadcast %cst_9 : f32 to vector<1x32xf32>
    %cst_10 = arith.constant 0.000000e+00 : f32
    %9 = vector.broadcast %cst_10 : f32 to vector<1x32xf32>
    %c0_i32 = arith.constant 0 : i32
    %c1_i32 = arith.constant 1 : i32
    %10 = arith.muli %c0_i32, %c1_i32 : i32
    %11 = arith.index_cast %10 : i32 to index
    %c0_11 = arith.constant 0 : index
    %12 = vector.load %arg7[%11, %c0_11] : memref<8x128xf32, #tpu.memory_space<vmem>>, vector<1x128xf32>
    %cst_12 = arith.constant dense<0.000000e+00> : vector<1x128xf32>
    %13 = tpu.matmul %8, %7, %cst_12 {dimension_numbers = #tpu.dot_dimension_numbers<[1], [0], [0], [1], [0, 0, 1, 1], [], []>} : vector<1x32xf32>, vector<32x128xf32>, vector<1x128xf32> -> vector<1x128xf32>
    %14 = arith.addf %12, %13 : vector<1x128xf32>
    %15 = arith.negf %14 : vector<1x128xf32>
    %16 = math.exp %15 : vector<1x128xf32>
    %cst_13 = arith.constant 1.000000e+00 : f32
    %17 = vector.broadcast %cst_13 : f32 to vector<1x128xf32>
    %18 = arith.addf %17, %16 : vector<1x128xf32>
    %19 = arith.divf %17, %18 : vector<1x128xf32>
    %20 = math.tanh %14 : vector<1x128xf32>
    %21 = vector.extract_strided_slice %19 {offsets = [0, 0], sizes = [1, 32], strides = [1, 1]} : vector<1x128xf32> to vector<1x32xf32>
    %22 = vector.extract_strided_slice %19 {offsets = [0, 32], sizes = [1, 32], strides = [1, 1]} : vector<1x128xf32> to vector<1x32xf32>
    %23 = vector.extract_strided_slice %20 {offsets = [0, 64], sizes = [1, 32], strides = [1, 1]} : vector<1x128xf32> to vector<1x32xf32>
    %24 = vector.extract_strided_slice %19 {offsets = [0, 96], sizes = [1, 32], strides = [1, 1]} : vector<1x128xf32> to vector<1x32xf32>
    %25 = arith.mulf %22, %9 : vector<1x32xf32>
    %26 = arith.mulf %21, %23 : vector<1x32xf32>
    %27 = arith.addf %25, %26 : vector<1x32xf32>
    %28 = math.tanh %27 : vector<1x32xf32>
    %29 = arith.mulf %24, %28 : vector<1x32xf32>
    %c1_i32_14 = arith.constant 1 : i32
    %c1_i32_15 = arith.constant 1 : i32
    %30 = arith.muli %c1_i32_14, %c1_i32_15 : i32
    %31 = arith.index_cast %30 : i32 to index
    %c0_16 = arith.constant 0 : index
    %32 = vector.load %arg7[%31, %c0_16] : memref<8x128xf32, #tpu.memory_space<vmem>>, vector<1x128xf32>
    %cst_17 = arith.constant dense<0.000000e+00> : vector<1x128xf32>
    %33 = tpu.matmul %29, %7, %cst_17 {dimension_numbers = #tpu.dot_dimension_numbers<[1], [0], [0], [1], [0, 0, 1, 1], [], []>} : vector<1x32xf32>, vector<32x128xf32>, vector<1x128xf32> -> vector<1x128xf32>
    %34 = arith.addf %32, %33 : vector<1x128xf32>
    %35 = arith.negf %34 : vector<1x128xf32>
    %36 = math.exp %35 : vector<1x128xf32>
    %cst_18 = arith.constant 1.000000e+00 : f32
    %37 = vector.broadcast %cst_18 : f32 to vector<1x128xf32>
    %38 = arith.addf %37, %36 : vector<1x128xf32>
    %39 = arith.divf %37, %38 : vector<1x128xf32>
    %40 = math.tanh %34 : vector<1x128xf32>
    %41 = vector.extract_strided_slice %39 {offsets = [0, 0], sizes = [1, 32], strides = [1, 1]} : vector<1x128xf32> to vector<1x32xf32>
    %42 = vector.extract_strided_slice %39 {offsets = [0, 32], sizes = [1, 32], strides = [1, 1]} : vector<1x128xf32> to vector<1x32xf32>
    %43 = vector.extract_strided_slice %40 {offsets = [0, 64], sizes = [1, 32], strides = [1, 1]} : vector<1x128xf32> to vector<1x32xf32>
    %44 = vector.extract_strided_slice %39 {offsets = [0, 96], sizes = [1, 32], strides = [1, 1]} : vector<1x128xf32> to vector<1x32xf32>
    %45 = arith.mulf %42, %27 : vector<1x32xf32>
    %46 = arith.mulf %41, %43 : vector<1x32xf32>
    %47 = arith.addf %45, %46 : vector<1x32xf32>
    %48 = math.tanh %47 : vector<1x32xf32>
    %49 = arith.mulf %44, %48 : vector<1x32xf32>
    %c2_i32 = arith.constant 2 : i32
    %c1_i32_19 = arith.constant 1 : i32
    %50 = arith.muli %c2_i32, %c1_i32_19 : i32
    %51 = arith.index_cast %50 : i32 to index
    %c0_20 = arith.constant 0 : index
    %52 = vector.load %arg7[%51, %c0_20] : memref<8x128xf32, #tpu.memory_space<vmem>>, vector<1x128xf32>
    %cst_21 = arith.constant dense<0.000000e+00> : vector<1x128xf32>
    %53 = tpu.matmul %49, %7, %cst_21 {dimension_numbers = #tpu.dot_dimension_numbers<[1], [0], [0], [1], [0, 0, 1, 1], [], []>} : vector<1x32xf32>, vector<32x128xf32>, vector<1x128xf32> -> vector<1x128xf32>
    %54 = arith.addf %52, %53 : vector<1x128xf32>
    %55 = arith.negf %54 : vector<1x128xf32>
    %56 = math.exp %55 : vector<1x128xf32>
    %cst_22 = arith.constant 1.000000e+00 : f32
    %57 = vector.broadcast %cst_22 : f32 to vector<1x128xf32>
    %58 = arith.addf %57, %56 : vector<1x128xf32>
    %59 = arith.divf %57, %58 : vector<1x128xf32>
    %60 = math.tanh %54 : vector<1x128xf32>
    %61 = vector.extract_strided_slice %59 {offsets = [0, 0], sizes = [1, 32], strides = [1, 1]} : vector<1x128xf32> to vector<1x32xf32>
    %62 = vector.extract_strided_slice %59 {offsets = [0, 32], sizes = [1, 32], strides = [1, 1]} : vector<1x128xf32> to vector<1x32xf32>
    %63 = vector.extract_strided_slice %60 {offsets = [0, 64], sizes = [1, 32], strides = [1, 1]} : vector<1x128xf32> to vector<1x32xf32>
    %64 = vector.extract_strided_slice %59 {offsets = [0, 96], sizes = [1, 32], strides = [1, 1]} : vector<1x128xf32> to vector<1x32xf32>
    %65 = arith.mulf %62, %47 : vector<1x32xf32>
    %66 = arith.mulf %61, %63 : vector<1x32xf32>
    %67 = arith.addf %65, %66 : vector<1x32xf32>
    %68 = math.tanh %67 : vector<1x32xf32>
    %69 = arith.mulf %64, %68 : vector<1x32xf32>
    %c3_i32 = arith.constant 3 : i32
    %c1_i32_23 = arith.constant 1 : i32
    %70 = arith.muli %c3_i32, %c1_i32_23 : i32
    %71 = arith.index_cast %70 : i32 to index
    %c0_24 = arith.constant 0 : index
    %72 = vector.load %arg7[%71, %c0_24] : memref<8x128xf32, #tpu.memory_space<vmem>>, vector<1x128xf32>
    %cst_25 = arith.constant dense<0.000000e+00> : vector<1x128xf32>
    %73 = tpu.matmul %69, %7, %cst_25 {dimension_numbers = #tpu.dot_dimension_numbers<[1], [0], [0], [1], [0, 0, 1, 1], [], []>} : vector<1x32xf32>, vector<32x128xf32>, vector<1x128xf32> -> vector<1x128xf32>
    %74 = arith.addf %72, %73 : vector<1x128xf32>
    %75 = arith.negf %74 : vector<1x128xf32>
    %76 = math.exp %75 : vector<1x128xf32>
    %cst_26 = arith.constant 1.000000e+00 : f32
    %77 = vector.broadcast %cst_26 : f32 to vector<1x128xf32>
    %78 = arith.addf %77, %76 : vector<1x128xf32>
    %79 = arith.divf %77, %78 : vector<1x128xf32>
    %80 = math.tanh %74 : vector<1x128xf32>
    %81 = vector.extract_strided_slice %79 {offsets = [0, 0], sizes = [1, 32], strides = [1, 1]} : vector<1x128xf32> to vector<1x32xf32>
    %82 = vector.extract_strided_slice %79 {offsets = [0, 32], sizes = [1, 32], strides = [1, 1]} : vector<1x128xf32> to vector<1x32xf32>
    %83 = vector.extract_strided_slice %80 {offsets = [0, 64], sizes = [1, 32], strides = [1, 1]} : vector<1x128xf32> to vector<1x32xf32>
    %84 = vector.extract_strided_slice %79 {offsets = [0, 96], sizes = [1, 32], strides = [1, 1]} : vector<1x128xf32> to vector<1x32xf32>
    %85 = arith.mulf %82, %67 : vector<1x32xf32>
    %86 = arith.mulf %81, %83 : vector<1x32xf32>
    %87 = arith.addf %85, %86 : vector<1x32xf32>
    %88 = math.tanh %87 : vector<1x32xf32>
    %89 = arith.mulf %84, %88 : vector<1x32xf32>
    %c4_i32 = arith.constant 4 : i32
    %c1_i32_27 = arith.constant 1 : i32
    %90 = arith.muli %c4_i32, %c1_i32_27 : i32
    %91 = arith.index_cast %90 : i32 to index
    %c0_28 = arith.constant 0 : index
    %92 = vector.load %arg7[%91, %c0_28] : memref<8x128xf32, #tpu.memory_space<vmem>>, vector<1x128xf32>
    %cst_29 = arith.constant dense<0.000000e+00> : vector<1x128xf32>
    %93 = tpu.matmul %89, %7, %cst_29 {dimension_numbers = #tpu.dot_dimension_numbers<[1], [0], [0], [1], [0, 0, 1, 1], [], []>} : vector<1x32xf32>, vector<32x128xf32>, vector<1x128xf32> -> vector<1x128xf32>
    %94 = arith.addf %92, %93 : vector<1x128xf32>
    %95 = arith.negf %94 : vector<1x128xf32>
    %96 = math.exp %95 : vector<1x128xf32>
    %cst_30 = arith.constant 1.000000e+00 : f32
    %97 = vector.broadcast %cst_30 : f32 to vector<1x128xf32>
    %98 = arith.addf %97, %96 : vector<1x128xf32>
    %99 = arith.divf %97, %98 : vector<1x128xf32>
    %100 = math.tanh %94 : vector<1x128xf32>
    %101 = vector.extract_strided_slice %99 {offsets = [0, 0], sizes = [1, 32], strides = [1, 1]} : vector<1x128xf32> to vector<1x32xf32>
    %102 = vector.extract_strided_slice %99 {offsets = [0, 32], sizes = [1, 32], strides = [1, 1]} : vector<1x128xf32> to vector<1x32xf32>
    %103 = vector.extract_strided_slice %100 {offsets = [0, 64], sizes = [1, 32], strides = [1, 1]} : vector<1x128xf32> to vector<1x32xf32>
    %104 = vector.extract_strided_slice %99 {offsets = [0, 96], sizes = [1, 32], strides = [1, 1]} : vector<1x128xf32> to vector<1x32xf32>
    %105 = arith.mulf %102, %87 : vector<1x32xf32>
    %106 = arith.mulf %101, %103 : vector<1x32xf32>
    %107 = arith.addf %105, %106 : vector<1x32xf32>
    %108 = math.tanh %107 : vector<1x32xf32>
    %109 = arith.mulf %104, %108 : vector<1x32xf32>
    %c5_i32 = arith.constant 5 : i32
    %c1_i32_31 = arith.constant 1 : i32
    %110 = arith.muli %c5_i32, %c1_i32_31 : i32
    %111 = arith.index_cast %110 : i32 to index
    %c0_32 = arith.constant 0 : index
    %112 = vector.load %arg7[%111, %c0_32] : memref<8x128xf32, #tpu.memory_space<vmem>>, vector<1x128xf32>
    %cst_33 = arith.constant dense<0.000000e+00> : vector<1x128xf32>
    %113 = tpu.matmul %109, %7, %cst_33 {dimension_numbers = #tpu.dot_dimension_numbers<[1], [0], [0], [1], [0, 0, 1, 1], [], []>} : vector<1x32xf32>, vector<32x128xf32>, vector<1x128xf32> -> vector<1x128xf32>
    %114 = arith.addf %112, %113 : vector<1x128xf32>
    %115 = arith.negf %114 : vector<1x128xf32>
    %116 = math.exp %115 : vector<1x128xf32>
    %cst_34 = arith.constant 1.000000e+00 : f32
    %117 = vector.broadcast %cst_34 : f32 to vector<1x128xf32>
    %118 = arith.addf %117, %116 : vector<1x128xf32>
    %119 = arith.divf %117, %118 : vector<1x128xf32>
    %120 = math.tanh %114 : vector<1x128xf32>
    %121 = vector.extract_strided_slice %119 {offsets = [0, 0], sizes = [1, 32], strides = [1, 1]} : vector<1x128xf32> to vector<1x32xf32>
    %122 = vector.extract_strided_slice %119 {offsets = [0, 32], sizes = [1, 32], strides = [1, 1]} : vector<1x128xf32> to vector<1x32xf32>
    %123 = vector.extract_strided_slice %120 {offsets = [0, 64], sizes = [1, 32], strides = [1, 1]} : vector<1x128xf32> to vector<1x32xf32>
    %124 = vector.extract_strided_slice %119 {offsets = [0, 96], sizes = [1, 32], strides = [1, 1]} : vector<1x128xf32> to vector<1x32xf32>
    %125 = arith.mulf %122, %107 : vector<1x32xf32>
    %126 = arith.mulf %121, %123 : vector<1x32xf32>
    %127 = arith.addf %125, %126 : vector<1x32xf32>
    %128 = math.tanh %127 : vector<1x32xf32>
    %129 = arith.mulf %124, %128 : vector<1x32xf32>
    %c6_i32 = arith.constant 6 : i32
    %c1_i32_35 = arith.constant 1 : i32
    %130 = arith.muli %c6_i32, %c1_i32_35 : i32
    %131 = arith.index_cast %130 : i32 to index
    %c0_36 = arith.constant 0 : index
    %132 = vector.load %arg7[%131, %c0_36] : memref<8x128xf32, #tpu.memory_space<vmem>>, vector<1x128xf32>
    %cst_37 = arith.constant dense<0.000000e+00> : vector<1x128xf32>
    %133 = tpu.matmul %129, %7, %cst_37 {dimension_numbers = #tpu.dot_dimension_numbers<[1], [0], [0], [1], [0, 0, 1, 1], [], []>} : vector<1x32xf32>, vector<32x128xf32>, vector<1x128xf32> -> vector<1x128xf32>
    %134 = arith.addf %132, %133 : vector<1x128xf32>
    %135 = arith.negf %134 : vector<1x128xf32>
    %136 = math.exp %135 : vector<1x128xf32>
    %cst_38 = arith.constant 1.000000e+00 : f32
    %137 = vector.broadcast %cst_38 : f32 to vector<1x128xf32>
    %138 = arith.addf %137, %136 : vector<1x128xf32>
    %139 = arith.divf %137, %138 : vector<1x128xf32>
    %140 = math.tanh %134 : vector<1x128xf32>
    %141 = vector.extract_strided_slice %139 {offsets = [0, 0], sizes = [1, 32], strides = [1, 1]} : vector<1x128xf32> to vector<1x32xf32>
    %142 = vector.extract_strided_slice %139 {offsets = [0, 32], sizes = [1, 32], strides = [1, 1]} : vector<1x128xf32> to vector<1x32xf32>
    %143 = vector.extract_strided_slice %140 {offsets = [0, 64], sizes = [1, 32], strides = [1, 1]} : vector<1x128xf32> to vector<1x32xf32>
    %144 = vector.extract_strided_slice %139 {offsets = [0, 96], sizes = [1, 32], strides = [1, 1]} : vector<1x128xf32> to vector<1x32xf32>
    %145 = arith.mulf %142, %127 : vector<1x32xf32>
    %146 = arith.mulf %141, %143 : vector<1x32xf32>
    %147 = arith.addf %145, %146 : vector<1x32xf32>
    %148 = math.tanh %147 : vector<1x32xf32>
    %149 = arith.mulf %144, %148 : vector<1x32xf32>
    %c7_i32 = arith.constant 7 : i32
    %c1_i32_39 = arith.constant 1 : i32
    %150 = arith.muli %c7_i32, %c1_i32_39 : i32
    %151 = arith.index_cast %150 : i32 to index
    %c0_40 = arith.constant 0 : index
    %152 = vector.load %arg7[%151, %c0_40] : memref<8x128xf32, #tpu.memory_space<vmem>>, vector<1x128xf32>
    %cst_41 = arith.constant dense<0.000000e+00> : vector<1x128xf32>
    %153 = tpu.matmul %149, %7, %cst_41 {dimension_numbers = #tpu.dot_dimension_numbers<[1], [0], [0], [1], [0, 0, 1, 1], [], []>} : vector<1x32xf32>, vector<32x128xf32>, vector<1x128xf32> -> vector<1x128xf32>
    %154 = arith.addf %152, %153 : vector<1x128xf32>
    %155 = arith.negf %154 : vector<1x128xf32>
    %156 = math.exp %155 : vector<1x128xf32>
    %cst_42 = arith.constant 1.000000e+00 : f32
    %157 = vector.broadcast %cst_42 : f32 to vector<1x128xf32>
    %158 = arith.addf %157, %156 : vector<1x128xf32>
    %159 = arith.divf %157, %158 : vector<1x128xf32>
    %160 = math.tanh %154 : vector<1x128xf32>
    %161 = vector.extract_strided_slice %159 {offsets = [0, 0], sizes = [1, 32], strides = [1, 1]} : vector<1x128xf32> to vector<1x32xf32>
    %162 = vector.extract_strided_slice %159 {offsets = [0, 32], sizes = [1, 32], strides = [1, 1]} : vector<1x128xf32> to vector<1x32xf32>
    %163 = vector.extract_strided_slice %160 {offsets = [0, 64], sizes = [1, 32], strides = [1, 1]} : vector<1x128xf32> to vector<1x32xf32>
    %164 = vector.extract_strided_slice %159 {offsets = [0, 96], sizes = [1, 32], strides = [1, 1]} : vector<1x128xf32> to vector<1x32xf32>
    %165 = arith.mulf %162, %147 : vector<1x32xf32>
    %166 = arith.mulf %161, %163 : vector<1x32xf32>
    %167 = arith.addf %165, %166 : vector<1x32xf32>
    %168 = math.tanh %167 : vector<1x32xf32>
    %169 = arith.mulf %164, %168 : vector<1x32xf32>
    %c8_i32 = arith.constant 8 : i32
    %c0_43 = arith.constant 0 : index
    %c0_44 = arith.constant 0 : index
    %170 = vector.load %arg4[%c0_43, %c0_44] : memref<1x32xf32, #tpu.memory_space<vmem>>, vector<1x32xf32>
    %171 = arith.mulf %169, %170 : vector<1x32xf32>
    %cst_45 = arith.constant dense<0.000000e+00> : vector<1xf32>
    %172 = vector.multi_reduction <add>, %171, %cst_45 [1] : vector<1x32xf32> to vector<1xf32>
    %173 = vector.shape_cast %172 : vector<1xf32> to vector<1x1xf32>
    %c0_46 = arith.constant 0 : index
    %c0_47 = arith.constant 0 : index
    %174 = vector.load %arg5[%c0_46, %c0_47] : memref<1x1xf32, #tpu.memory_space<vmem>>, vector<1x1xf32>
    %175 = arith.addf %173, %174 : vector<1x1xf32>
    %c0_48 = arith.constant 0 : index
    %c0_49 = arith.constant 0 : index
    %176 = vector.load %arg6[%c0_48, %c0_49] : memref<1x1xf32, #tpu.memory_space<vmem>>, vector<1x1xf32>
    tpu.vector_store %arg6[%c0_48, %c0_49], %175 {strides = array<i32>} : memref<1x1xf32, #tpu.memory_space<vmem>>, vector<1x1xf32>,
    return
  }
}

</mosaic_0001>

<bundles_post_ra>
// kernel: tpu_custom_call.1
= control target key start
LH: loop header
LB: loop body
LE: loop exit
PB: predicated region body
PF: predicated region fallthrough
CT: control target
= control target key end

     0   :  { %s1479_s0 = inlined_call_operand.vmem [shape: f32[8,4], index: 0, kind: input, shape index: {}]   ;;  %s1480_s1 = inlined_call_operand.vmem [shape: f32[4,128], index: 1, kind: input, shape index: {}]   ;;  %s1481_s2 = inlined_call_operand.hbm [shape: f32[32,128], index: 2, kind: input, shape index: {}]   ;;  %s1482_s3 = inlined_call_operand.vmem [shape: f32[1,128], index: 3, kind: input, shape index: {}]   ;;  %s1483_s4 = inlined_call_operand.vmem [shape: f32[1,32], index: 4, kind: input, shape index: {}]   ;;  %s1484_s5 = inlined_call_operand.<no memory space> [shape: f32[1,1], index: 5, kind: input, shape index: {}]   ;;  %s1485_s6 = inlined_call_operand.hbm [shape: f32[1,1], index: 6, kind: output, shape index: {}]  }
   0x1   :  { %v11_v0 = vstv %s1484_s5 }
   0x2   :  { %12 = vst [vmem:[#allocation3] sm:$0x1] %v11_v0 }
   0x3   :  { %13 = vsyncpa [#allocation5], 0 }
   0x4   :  { %14 = vsyncpa [#allocation6], 0  ;;  %s1300_s23 = smov [#allocation4]   ;;  %s1252_s27 = scalar_lea.hbm %s1481_s2, 512 }
   0x5   :  { %s24_s24 = sshll.u32 %s1300_s23, 4  ;;  %p1253_p0 = scmp.ne.s32.totalorder %s1481_s2, %s1252_s27  ;;  %s25_s24 = int_to_ptr.vmem [resolvable:$true] %s24_s24 }
   0x6   :  { %p1256_p1 = scmp.lt.u32.totalorder %s1252_s27, %s1481_s2 }
   0x8   :  { %p1258_p2 = pnand %p1256_p1, %p1253_p0 }
   0xa   :  { %1261 = shalt.err (!%p1258_p2)
}
   0xb   :  { %s1262_s5 = scalar_lea.vmem %s25_s24, 512  ;;  %p1267_p4 = scmp.lt.s32.totalorder %s25_s24, %s25_s24 }
   0xc   :  { %p1263_p3 = scmp.ne.s32.totalorder %s25_s24, %s1262_s5  ;;  %p1268_p5 = scmp.lt.s32.totalorder %s1262_s5, %s1262_s5 }
   0xe   :  { %p1269_p6 = por %p1268_p5, %p1267_p4 }
  0x10   :  { %p1270_p7 = pnand %p1269_p6, %p1263_p3 }
  0x12   :  { %1273 = shalt.err (!%p1270_p7)
}
  0x13   :  { %s1301_s8 = smov 128   ;;  %s1302_s9 = smov 8  }
  0x14   :  { %30 = dma.hbm_to_vmem [thread:$0]  %s1481_s2, 512, %s25_s24, [#allocation5], %s1301_s8, %s1301_s8, %s1302_s9  }
  0x15   :  { %1296 = dma.done.wait [#allocation5], 512  }
  0x16   :  { %1297 = vsyncadd [#allocation5], 4294966784  ;;  %v1303_v1 = vmov 0.0   ;;  %vm1304_vm0 = vmmov 0   ;;  %v1305_v2 = vmov 0.0|0.0   ;;  %vm53_vm1 = vcmask 1043456  }
  0x17   :  { %1037 = vmatprep.subr.mxu0 %v1303_v1  ;;  %1039 = vmatprep.mubr.msk.f32.mxu0 %vm1304_vm0, %v1303_v1  ;;  %vm49_vm2 = vcmask 31744   ;;  %v41_v3 = vld [vmem:[%s1480_s1] sm:$0xf]  ;;  %v128_v5 = vld [vmem:[#allocation4] sm:$0xff]  ;;  %v129_v6 = vld [vmem:[#allocation4 + $0x8] sm:$0xff]  ;;  %s1306_s15 = smov 64  }
  0x18   :  { %1130 = vmatprep.subr.bf16.mxu1 %v1305_v2  ;;  %1050 = vmatprep.mubr.msk.f32.mxu1 %vm1304_vm0, %v1303_v1  ;;  %v40_v4 = vld [vmem:[%s1479_s0] sm:$0xff]  ;;  %v1372_v9 = vpack.c.bf16 %v129_v6, %v128_v5  ;;  %vm133_vm3 = vcmask 261120   ;;  %s1308_s18 = smov 96   ;;  %vm953_vm4 = vcmask 253952   ;;  %vm959_vm5 = vcmask 0  }
  0x19   :  { %1038 = vmatpush3.msk.msra.mxu0 %vm53_vm1, %v41_v3  ;;  %v130_v7 = vld [vmem:[#allocation4 + $0x10] sm:$0xff]  ;;  %v131_v8 = vld [vmem:[#allocation4 + $0x18] sm:$0xff] }
  0x1a   :  { %1040 = vmatmul.mubr.msk.f32.vlgmr.msra.gmra.mrb[0].mxu0 %vm49_vm2, %v40_v4  ;;  %1136 = vmatprep.subr.bf16.mxu0 %v1305_v2  ;;  %v1378_v10 = vpack.c.bf16 %v131_v8, %v130_v7  ;;  %v976_v11 = vld [vmem:[%s1482_s3] ss:$0 sm:$0xff]  ;;  %s1307_s3 = smov 32  }
  0x1b   :  { %1061 = vmatprep.mubr.msk.f32.mxu0 %vm1304_vm0, %v1303_v1  ;;  %1132 = vmatpush3.bf16.msra.mxu1 %v1372_v9 }
  0x1c   :  { %1138 = vmatpush3.bf16.msra.mxu0 %v1372_v9  ;;  %1133 = vmatprep.subr.bf16.mxu1 %v1305_v2 }
  0x1d   :  { %1139 = vmatprep.subr.bf16.mxu0 %v1305_v2 }
  0x1f   :  { %1135 = vmatpush3.bf16.msra.mxu1 %v1378_v10 }
  0x20   :  { %1141 = vmatpush3.bf16.msra.mxu0 %v1378_v10  ;;  %1142 = vmatprep.subr.bf16.mxu1 %v1305_v2 }
  0x21   :  { %1148 = vmatprep.subr.bf16.mxu0 %v1305_v2 }
  0x22   :  { %1051 = vmatmul.mubr.f32.vlgmr.msra.gmra.mrb[0].mxu1 %v1303_v1 }
  0x23   :  { %1144 = vmatpush3.bf16.msra.mxu1 %v1372_v9  ;;  %1072 = vmatprep.mubr.msk.f32.mxu1 %vm1304_vm0, %v1303_v1 }
  0x24   :  { %1145 = vmatprep.subr.bf16.mxu1 %v1305_v2 }
  0x27   :  { %1147 = vmatpush3.bf16.msra.mxu1 %v1378_v10 }
  0x28   :  { %1154 = vmatprep.subr.bf16.mxu1 %v1305_v2 }
  0xed   :  { %v123_v12 = vpop.f32.mrb[0].mxu0 }
  0xee   :  { %v124_v13 = vadd.f32 %v976_v11, %v123_v12  ;;  %v1041_v14 = vpop.f32.mrb[1].mxu0 }
  0xf0   :  { %127 = vst [vmem:[#allocation2] sm:$0xff] %v124_v13 }
  0xf5   :  { %v203_v15 = vpop.f32.mrb[0].mxu1 }
  0xf6   :  { %v1052_v17 = vpop.f32.mrb[1].mxu1 }
  0xf7   :  { %v132_v16 = vld [vmem:[#allocation2] sm:$0x1]  ;;  %v232_v33 = vld [vmem:[#allocation2 + $0x1] sm:$0x1]  ;;  %v333_v51 = vld [vmem:[#allocation2 + $0x2] sm:$0x1] }
  0xf8   :  { %v207_v18 = vadd.f32 %v203_v15, %v132_v16  ;;  %v434_v7 = vld [vmem:[#allocation2 + $0x3] sm:$0x1] }
  0xfa   :  { %1188 = vtanh.f32 %v207_v18  ;;  %v979_v20 = vmul.f32 -1.442695, %v207_v18 }
  0xfc   :  { %1190 = vpow2.f32 %v979_v20 }
 0x104   :  { %v1189_v19 = vpop.eup %1188 }
 0x105   :  { %217 = vrot.lane.b32.xlu0 %v1189_v19, %s1306_s15 }
 0x106   :  { %v1191_v21 = vpop.eup %1190 }
 0x107   :  { %v211_v22 = vadd.f32 1.0, %v1191_v21 }
 0x109   :  { %1192 = vrcp.f32 %v211_v22 }
 0x113   :  { %v1193_v23 = vpop.eup %1192 }
 0x114   :  { %v215_v26 = vmul.f32 0.0, %v1193_v23 }
 0x177   :  { %v218_v24 = vpop.permute.xlu0 %217 }
 0x178   :  { %v220_v25 = vmul.f32 %v1193_v23, %v218_v24 }
 0x17a   :  { %222 = vrot.lane.b32.xlu0 %v220_v25, %s1307_s3 }
 0x1ec   :  { %v223_v27 = vpop.permute.xlu0 %222 }
 0x1ed   :  { %v225_v28 = vadd.f32 %v223_v27, %v215_v26  ;;  %v535_v27 = vld [vmem:[#allocation2 + $0x4] sm:$0x1] }
 0x1ef   :  { %1194 = vtanh.f32 %v225_v28 }
 0x1f9   :  { %v1195_v29 = vpop.eup %1194 }
 0x1fa   :  { %228 = vrot.lane.b32.xlu1 %v1195_v29, %s1306_s15 }
 0x26c   :  { %v229_v30 = vpop.permute.xlu1 %228 }
 0x26d   :  { %v231_v31 = vmul.f32 %v1193_v23, %v229_v30 }
 0x26f   :  { %234 = vrot.lane.b32.xlu1 %v231_v31, %s1307_s3 }
 0x2e1   :  { %v235_v32 = vpop.permute.xlu1 %234 }
 0x2e2   :  { %1062 = vmatmul.mubr.msk.f32.vlgmr.msra.gmra.mrb[2].mxu0 %vm133_vm3, %v235_v32 }
 0x2e3   :  { %1150 = vmatpush3.bf16.msra.mxu0 %v1372_v9  ;;  %1083 = vmatprep.mubr.msk.f32.mxu0 %vm1304_vm0, %v1303_v1 }
 0x2e4   :  { %1151 = vmatprep.subr.bf16.mxu0 %v1305_v2 }
 0x2e7   :  { %1153 = vmatpush3.bf16.msra.mxu0 %v1378_v10 }
 0x2e8   :  { %1160 = vmatprep.subr.bf16.mxu0 %v1305_v2 }
 0x3b5   :  { %v304_v34 = vpop.f32.mrb[2].mxu0 }
 0x3b6   :  { %v308_v35 = vadd.f32 %v304_v34, %v232_v33  ;;  %v1063_v36 = vpop.f32.mrb[3].mxu0 }
 0x3b8   :  { %1196 = vtanh.f32 %v308_v35  ;;  %v981_v38 = vmul.f32 -1.442695, %v308_v35 }
 0x3ba   :  { %1198 = vpow2.f32 %v981_v38 }
 0x3c2   :  { %v1197_v37 = vpop.eup %1196 }
 0x3c3   :  { %318 = vrot.lane.b32.xlu0 %v1197_v37, %s1306_s15 }
 0x3c4   :  { %v1199_v39 = vpop.eup %1198 }
 0x3c5   :  { %v312_v40 = vadd.f32 1.0, %v1199_v39 }
 0x3c7   :  { %1200 = vrcp.f32 %v312_v40 }
 0x3d1   :  { %v1201_v41 = vpop.eup %1200 }
 0x3d2   :  { %v316_v44 = vmul.f32 %v1201_v41, %v225_v28 }
 0x435   :  { %v319_v42 = vpop.permute.xlu0 %318 }
 0x436   :  { %v321_v43 = vmul.f32 %v1201_v41, %v319_v42 }
 0x438   :  { %323 = vrot.lane.b32.xlu1 %v321_v43, %s1307_s3 }
 0x4aa   :  { %v324_v45 = vpop.permute.xlu1 %323 }
 0x4ab   :  { %v326_v46 = vadd.f32 %v324_v45, %v316_v44  ;;  %v636_v45 = vld [vmem:[#allocation2 + $0x5] sm:$0x1] }
 0x4ad   :  { %1202 = vtanh.f32 %v326_v46 }
 0x4b7   :  { %v1203_v47 = vpop.eup %1202 }
 0x4b8   :  { %329 = vrot.lane.b32.xlu0 %v1203_v47, %s1306_s15 }
 0x52a   :  { %v330_v48 = vpop.permute.xlu0 %329 }
 0x52b   :  { %v332_v49 = vmul.f32 %v1201_v41, %v330_v48 }
 0x52d   :  { %335 = vrot.lane.b32.xlu1 %v332_v49, %s1307_s3 }
 0x59f   :  { %v336_v50 = vpop.permute.xlu1 %335 }
 0x5a0   :  { %1073 = vmatmul.mubr.msk.f32.vlgmr.msra.gmra.mrb[2].mxu1 %vm133_vm3, %v336_v50 }
 0x5a1   :  { %1156 = vmatpush3.bf16.msra.mxu1 %v1372_v9  ;;  %1094 = vmatprep.mubr.msk.f32.mxu1 %vm1304_vm0, %v1303_v1 }
 0x5a2   :  { %1157 = vmatprep.subr.bf16.mxu1 %v1305_v2 }
 0x5a5   :  { %1159 = vmatpush3.bf16.msra.mxu1 %v1378_v10 }
 0x5a6   :  { %1166 = vmatprep.subr.bf16.mxu1 %v1305_v2 }
 0x673   :  { %v405_v52 = vpop.f32.mrb[2].mxu1 }
 0x674   :  { %v409_v53 = vadd.f32 %v405_v52, %v333_v51  ;;  %v1074_v54 = vpop.f32.mrb[3].mxu1 }
 0x676   :  { %1204 = vtanh.f32 %v409_v53  ;;  %v983_v56 = vmul.f32 -1.442695, %v409_v53 }
 0x678   :  { %1206 = vpow2.f32 %v983_v56 }
 0x680   :  { %v1205_v55 = vpop.eup %1204 }
 0x681   :  { %419 = vrot.lane.b32.xlu0 %v1205_v55, %s1306_s15 }
 0x682   :  { %v1207_v57 = vpop.eup %1206 }
 0x683   :  { %v413_v58 = vadd.f32 1.0, %v1207_v57 }
 0x685   :  { %1208 = vrcp.f32 %v413_v58 }
 0x68f   :  { %v1209_v59 = vpop.eup %1208 }
 0x690   :  { %v417_v62 = vmul.f32 %v1209_v59, %v326_v46 }
 0x6f3   :  { %v420_v60 = vpop.permute.xlu0 %419 }
 0x6f4   :  { %v422_v61 = vmul.f32 %v1209_v59, %v420_v60 }
 0x6f6   :  { %424 = vrot.lane.b32.xlu1 %v422_v61, %s1307_s3 }
 0x768   :  { %v425_v63 = vpop.permute.xlu1 %424 }
 0x769   :  { %v427_v0 = vadd.f32 %v425_v63, %v417_v62 }
 0x76b   :  { %1210 = vtanh.f32 %v427_v0 }
 0x775   :  { %v1211_v3 = vpop.eup %1210 }
 0x776   :  { %430 = vrot.lane.b32.xlu0 %v1211_v3, %s1306_s15 }
 0x7e8   :  { %v431_v4 = vpop.permute.xlu0 %430 }
 0x7e9   :  { %v433_v5 = vmul.f32 %v1209_v59, %v431_v4  ;;  %v737_v59 = vld [vmem:[#allocation2 + $0x6] sm:$0x1] }
 0x7eb   :  { %436 = vrot.lane.b32.xlu1 %v433_v5, %s1307_s3 }
 0x85d   :  { %v437_v6 = vpop.permute.xlu1 %436 }
 0x85e   :  { %1084 = vmatmul.mubr.msk.f32.vlgmr.msra.gmra.mrb[4].mxu0 %vm133_vm3, %v437_v6 }
 0x85f   :  { %1162 = vmatpush3.bf16.msra.mxu0 %v1372_v9  ;;  %1105 = vmatprep.mubr.msk.f32.mxu0 %vm1304_vm0, %v1303_v1 }
 0x860   :  { %1163 = vmatprep.subr.bf16.mxu0 %v1305_v2 }
 0x863   :  { %1165 = vmatpush3.bf16.msra.mxu0 %v1378_v10 }
 0x864   :  { %1172 = vmatprep.subr.bf16.mxu0 %v1305_v2 }
 0x931   :  { %v506_v8 = vpop.f32.mrb[4].mxu0 }
 0x932   :  { %v510_v11 = vadd.f32 %v506_v8, %v434_v7  ;;  %v1085_v12 = vpop.f32.mrb[5].mxu0 }
 0x934   :  { %1212 = vtanh.f32 %v510_v11  ;;  %v985_v14 = vmul.f32 -1.442695, %v510_v11 }
 0x936   :  { %1214 = vpow2.f32 %v985_v14 }
 0x93e   :  { %v1213_v13 = vpop.eup %1212 }
 0x93f   :  { %520 = vrot.lane.b32.xlu0 %v1213_v13, %s1306_s15 }
 0x940   :  { %v1215_v15 = vpop.eup %1214 }
 0x941   :  { %v514_v16 = vadd.f32 1.0, %v1215_v15 }
 0x943   :  { %1216 = vrcp.f32 %v514_v16 }
 0x94d   :  { %v1217_v17 = vpop.eup %1216 }
 0x94e   :  { %v518_v20 = vmul.f32 %v1217_v17, %v427_v0 }
 0x9b1   :  { %v521_v18 = vpop.permute.xlu0 %520 }
 0x9b2   :  { %v523_v19 = vmul.f32 %v1217_v17, %v521_v18 }
 0x9b4   :  { %525 = vrot.lane.b32.xlu1 %v523_v19, %s1307_s3 }
 0xa26   :  { %v526_v21 = vpop.permute.xlu1 %525 }
 0xa27   :  { %v528_v22 = vadd.f32 %v526_v21, %v518_v20 }
 0xa29   :  { %1218 = vtanh.f32 %v528_v22 }
 0xa33   :  { %v1219_v23 = vpop.eup %1218 }
 0xa34   :  { %531 = vrot.lane.b32.xlu0 %v1219_v23, %s1306_s15 }
 0xaa6   :  { %v532_v24 = vpop.permute.xlu0 %531 }
 0xaa7   :  { %v534_v25 = vmul.f32 %v1217_v17, %v532_v24  ;;  %v838_v17 = vld [vmem:[#allocation2 + $0x7] sm:$0x1] }
 0xaa9   :  { %537 = vrot.lane.b32.xlu1 %v534_v25, %s1307_s3 }
 0xb1b   :  { %v538_v26 = vpop.permute.xlu1 %537 }
 0xb1c   :  { %1095 = vmatmul.mubr.msk.f32.vlgmr.msra.gmra.mrb[4].mxu1 %vm133_vm3, %v538_v26 }
 0xb1d   :  { %1168 = vmatpush3.bf16.msra.mxu1 %v1372_v9  ;;  %1116 = vmatprep.mubr.msk.f32.mxu1 %vm1304_vm0, %v1303_v1 }
 0xb1e   :  { %1169 = vmatprep.subr.bf16.mxu1 %v1305_v2 }
 0xb21   :  { %1171 = vmatpush3.bf16.msra.mxu1 %v1378_v10 }
 0xbef   :  { %v607_v28 = vpop.f32.mrb[4].mxu1 }
 0xbf0   :  { %v611_v29 = vadd.f32 %v607_v28, %v535_v27  ;;  %v1096_v30 = vpop.f32.mrb[5].mxu1  ;;  %v994_v28 = vld [vmem:[%s1483_s4] ss:$0 sm:$0xff]  ;;  %s1309_s4 = smov [#allocation7]  }
 0xbf1   :  { %s967_s19 = sshll.u32 %s1309_s4, 4  ;;  %s968_s19 = int_to_ptr.vmem [resolvable:$true] %s967_s19 }
 0xbf2   :  { %1220 = vtanh.f32 %v611_v29  ;;  %v987_v32 = vmul.f32 -1.442695, %v611_v29  ;;  %s1274_s20 = scalar_lea.vmem %s968_s19, 16  ;;  %s1278_s21 = scalar_lea.vmem %s968_s19, 32 }
 0xbf3   :  { %p1275_p8 = scmp.ne.s32.totalorder %s968_s19, %s1274_s20  ;;  %p1279_p9 = scmp.lt.s32.totalorder %s968_s19, %s968_s19 }
 0xbf4   :  { %1222 = vpow2.f32 %v987_v32  ;;  %p1280_p10 = scmp.lt.s32.totalorder %s1278_s21, %s1274_s20 }
 0xbf6   :  { %p1281_p11 = por %p1280_p10, %p1279_p9 }
 0xbf8   :  { %p1282_p12 = pnand %p1281_p11, %p1275_p8 }
 0xbfc   :  { %v1221_v31 = vpop.eup %1220 }
 0xbfd   :  { %621 = vrot.lane.b32.xlu0 %v1221_v31, %s1306_s15 }
 0xbfe   :  { %v1223_v33 = vpop.eup %1222 }
 0xbff   :  { %v615_v34 = vadd.f32 1.0, %v1223_v33 }
 0xc01   :  { %1224 = vrcp.f32 %v615_v34 }
 0xc0b   :  { %v1225_v35 = vpop.eup %1224 }
 0xc0c   :  { %v619_v38 = vmul.f32 %v1225_v35, %v528_v22 }
 0xc6f   :  { %v622_v36 = vpop.permute.xlu0 %621 }
 0xc70   :  { %v624_v37 = vmul.f32 %v1225_v35, %v622_v36 }
 0xc72   :  { %626 = vrot.lane.b32.xlu1 %v624_v37, %s1307_s3 }
 0xce4   :  { %v627_v39 = vpop.permute.xlu1 %626 }
 0xce5   :  { %v629_v40 = vadd.f32 %v627_v39, %v619_v38  ;;  %v957_v39 = vld [vmem:[#allocation3] sm:$0x1] }
 0xce7   :  { %1226 = vtanh.f32 %v629_v40 }
 0xcf1   :  { %v1227_v41 = vpop.eup %1226 }
 0xcf2   :  { %632 = vrot.lane.b32.xlu0 %v1227_v41, %s1306_s15 }
 0xd64   :  { %v633_v42 = vpop.permute.xlu0 %632 }
 0xd65   :  { %v635_v43 = vmul.f32 %v1225_v35, %v633_v42 }
 0xd67   :  { %638 = vrot.lane.b32.xlu1 %v635_v43, %s1307_s3 }
 0xdd9   :  { %v639_v44 = vpop.permute.xlu1 %638 }
 0xdda   :  { %1106 = vmatmul.mubr.msk.f32.vlgmr.msra.gmra.mrb[6].mxu0 %vm133_vm3, %v639_v44 }
 0xddb   :  { %1174 = vmatpush3.bf16.msra.mxu0 %v1372_v9  ;;  %1127 = vmatprep.mubr.msk.f32.mxu0 %vm1304_vm0, %v1303_v1 }
 0xddc   :  { %1175 = vmatprep.subr.bf16.mxu0 %v1305_v2 }
 0xddf   :  { %1177 = vmatpush3.bf16.msra.mxu0 %v1378_v10 }
 0xead   :  { %v708_v46 = vpop.f32.mrb[6].mxu0 }
 0xeae   :  { %v712_v47 = vadd.f32 %v708_v46, %v636_v45  ;;  %v1107_v48 = vpop.f32.mrb[7].mxu0 }
 0xeb0   :  { %1228 = vtanh.f32 %v712_v47  ;;  %v989_v50 = vmul.f32 -1.442695, %v712_v47 }
 0xeb2   :  { %1230 = vpow2.f32 %v989_v50 }
 0xeba   :  { %v1229_v49 = vpop.eup %1228 }
 0xebb   :  { %722 = vrot.lane.b32.xlu0 %v1229_v49, %s1306_s15 }
 0xebc   :  { %v1231_v51 = vpop.eup %1230 }
 0xebd   :  { %v716_v52 = vadd.f32 1.0, %v1231_v51 }
 0xebf   :  { %1232 = vrcp.f32 %v716_v52 }
 0xec9   :  { %v1233_v9 = vpop.eup %1232 }
 0xeca   :  { %v720_v2 = vmul.f32 %v1233_v9, %v629_v40 }
 0xf2d   :  { %v723_v53 = vpop.permute.xlu0 %722 }
 0xf2e   :  { %v725_v1 = vmul.f32 %v1233_v9, %v723_v53 }
 0xf30   :  { %727 = vrot.lane.b32.xlu1 %v725_v1, %s1307_s3 }
 0xfa2   :  { %v728_v10 = vpop.permute.xlu1 %727 }
 0xfa3   :  { %v730_v54 = vadd.f32 %v728_v10, %v720_v2 }
 0xfa5   :  { %1234 = vtanh.f32 %v730_v54 }
 0xfaf   :  { %v1235_v55 = vpop.eup %1234 }
 0xfb0   :  { %733 = vrot.lane.b32.xlu0 %v1235_v55, %s1306_s15 }
0x1022   :  { %v734_v56 = vpop.permute.xlu0 %733 }
0x1023   :  { %v736_v57 = vmul.f32 %v1233_v9, %v734_v56 }
0x1025   :  { %739 = vrot.lane.b32.xlu1 %v736_v57, %s1307_s3 }
0x1097   :  { %v740_v58 = vpop.permute.xlu1 %739 }
0x1098   :  { %1117 = vmatmul.mubr.msk.f32.vlgmr.msra.gmra.mrb[6].mxu1 %vm133_vm3, %v740_v58 }
0x116b   :  { %v809_v60 = vpop.f32.mrb[6].mxu1 }
0x116c   :  { %v813_v61 = vadd.f32 %v809_v60, %v737_v59  ;;  %v1118_v62 = vpop.f32.mrb[7].mxu1 }
0x116e   :  { %1236 = vtanh.f32 %v813_v61  ;;  %v991_v0 = vmul.f32 -1.442695, %v813_v61 }
0x1170   :  { %1238 = vpow2.f32 %v991_v0 }
0x1178   :  { %v1237_v63 = vpop.eup %1236 }
0x1179   :  { %823 = vrot.lane.b32.xlu0 %v1237_v63, %s1306_s15 }
0x117a   :  { %v1239_v3 = vpop.eup %1238 }
0x117b   :  { %v817_v4 = vadd.f32 1.0, %v1239_v3 }
0x117d   :  { %1240 = vrcp.f32 %v817_v4 }
0x1187   :  { %v1241_v5 = vpop.eup %1240 }
0x1188   :  { %v821_v8 = vmul.f32 %v1241_v5, %v730_v54 }
0x11eb   :  { %v824_v6 = vpop.permute.xlu0 %823 }
0x11ec   :  { %v826_v7 = vmul.f32 %v1241_v5, %v824_v6 }
0x11ee   :  { %828 = vrot.lane.b32.xlu1 %v826_v7, %s1307_s3 }
0x1260   :  { %v829_v11 = vpop.permute.xlu1 %828 }
0x1261   :  { %v831_v12 = vadd.f32 %v829_v11, %v821_v8 }
0x1263   :  { %1242 = vtanh.f32 %v831_v12 }
0x126d   :  { %v1243_v13 = vpop.eup %1242 }
0x126e   :  { %834 = vrot.lane.b32.xlu0 %v1243_v13, %s1306_s15 }
0x12e0   :  { %v835_v14 = vpop.permute.xlu0 %834 }
0x12e1   :  { %v837_v15 = vmul.f32 %v1241_v5, %v835_v14 }
0x12e3   :  { %840 = vrot.lane.b32.xlu1 %v837_v15, %s1307_s3 }
0x1355   :  { %v841_v16 = vpop.permute.xlu1 %840 }
0x1356   :  { %1128 = vmatmul.mubr.msk.f32.vlgmr.msra.gmra.mrb[8].mxu0 %vm133_vm3, %v841_v16 }
0x1429   :  { %v910_v18 = vpop.f32.mrb[8].mxu0 }
0x142a   :  { %v914_v19 = vadd.f32 %v910_v18, %v838_v17  ;;  %v1129_v20 = vpop.f32.mrb[9].mxu0 }
0x142c   :  { %1244 = vtanh.f32 %v914_v19  ;;  %v993_v22 = vmul.f32 -1.442695, %v914_v19 }
0x142e   :  { %1246 = vpow2.f32 %v993_v22 }
0x1436   :  { %v1245_v21 = vpop.eup %1244 }
0x1437   :  { %924 = vrot.lane.b32.xlu0 %v1245_v21, %s1306_s15 }
0x1438   :  { %v1247_v23 = vpop.eup %1246 }
0x1439   :  { %v918_v24 = vadd.f32 1.0, %v1247_v23 }
0x143b   :  { %1248 = vrcp.f32 %v918_v24 }
0x1445   :  { %v1249_v25 = vpop.eup %1248 }
0x1446   :  { %v922_v29 = vmul.f32 %v1249_v25, %v831_v12 }
0x14a9   :  { %v925_v26 = vpop.permute.xlu0 %924 }
0x14aa   :  { %v927_v27 = vmul.f32 %v1249_v25, %v925_v26 }
0x14ac   :  { %929 = vrot.lane.b32.xlu1 %v927_v27, %s1307_s3 }
0x14b0   :  { %945 = vrot.lane.b32.xlu1 %v994_v28, %s1308_s18 }
0x151e   :  { %v930_v30 = vpop.permute.xlu1 %929 }
0x151f   :  { %v932_v31 = vadd.f32 %v930_v30, %v922_v29 }
0x1521   :  { %1250 = vtanh.f32 %v932_v31 }
0x1522   :  { %v946_v34 = vpop.permute.xlu1 %945 }
0x152b   :  { %v1251_v32 = vpop.eup %1250 }
0x152c   :  { %935 = vrot.lane.b32.xlu0 %v1251_v32, %s1306_s15 }
0x159e   :  { %v936_v33 = vpop.permute.xlu0 %935 }
0x159f   :  { %v938_v35 = vmul.f32 %v1249_v25, %v936_v33 }
0x15a1   :  { %v948_v36 = vmul.f32 %v946_v34, %v938_v35 }
0x15a3   :  { %950 = vrot.lane.b32.xlu0 %v948_v36, %s1307_s3 }
0x1615   :  { %v951_v37 = vpop.permute.xlu0 %950 }
0x1616   :  { %v954_v38 = vsel %vm953_vm4, %v951_v37, 0.0 }
0x1617   :  { %955 = vadd.xlane.f32.xlu1 %v954_v38 }
0x16a4   :  { %v956_v40 = vpop.xlane.xlu1 %955 }
0x16a5   :  { %v958_v41 = vadd.f32 %v957_v39, %v956_v40 }
0x16a7   :  { %960 = vst.msk [vmem:[#allocation7] sm:$0x1] %vm959_vm5, %v958_v41 }
0x16a8   :  { %1285 = shalt.err (!%p1282_p12)
}
0x16a9   :  { %s1286_s24 = scalar_lea.hbm %s1485_s6, 16 }
0x16aa   :  { %p1287_p13 = scmp.ne.s32.totalorder %s1485_s6, %s1286_s24  ;;  %p1290_p0 = scmp.lt.u32.totalorder %s1286_s24, %s1485_s6 }
0x16ac   :  { %p1292_p1 = pnand %p1290_p0, %p1287_p13 }
0x16ae   :  { %1295 = shalt.err (!%p1292_p1)
}
0x16af   :  { %970 = dma.vmem_to_hbm [thread:$0]  %s968_s19, 16, %s1485_s6, [#allocation6]  }
0x16b0   :  { %1298 = dma.done.wait [#allocation6], 16  }
0x16b1   :  { %1299 = vsyncadd [#allocation6], 4294967280 }
0x16b2   :  { %974 = vsyncpa [#allocation5], 1 }
0x16b3   :  { %975 = vsyncpa [#allocation6], 1 }

</bundles_post_ra>
